<compile_context>
chip_gen: v7x
topology: tpu7x:2x2x1
jax: 0.10.0
libtpu: 0.0.40
codegen_flags: <defaults>
</compile_context>

<pallas_src>
import jax
import jax.numpy as jnp
from jax.experimental import pallas as pl
from jax.experimental.pallas import tpu as pltpu

NEG_SLOPE = 0.01  # nn.LeakyReLU default


def _leaky_relu(x):
    # slope < 1  =>  leaky_relu(x) == max(x, slope * x)
    return jnp.maximum(x, NEG_SLOPE * x)


def net_kernel(x_ref,
               w1_ref, b1_ref, w2_ref, b2_ref,
               w3_ref, b3_ref, w4_ref, b4_ref,
               o_ref):
    # x_ref:  (2,   TB)  — batch on lanes
    # w1_ref: (64,  2)   — input scaling already folded into its columns
    # w2_ref: (128, 64), w3_ref: (64, 128)  — MXU weights (out, in)
    # w4_ref: (64,  2)   — kept (in, out) for the VPU/XLU formulation
    # b*_ref: (out, 1)   — lane-broadcast biases
    # o_ref:  (2,   TB)
    x = x_ref[...]

    # ---- layer 1 (in=2): K=2 would waste an MXU push+stream; do it on the
    # otherwise-idle VPU as an outer product -----------------------------------
    w1 = w1_ref[...]                                               # (64, 2)
    h = w1[:, 0:1] * x[0:1, :] + w1[:, 1:2] * x[1:2, :] + b1_ref[...]
    h = _leaky_relu(h)                                             # (64, TB)

    # ---- layers 2/3: the real MXU work (K=64/128, N=TB on lanes) -------------
    h = jnp.dot(w2_ref[...], h, preferred_element_type=jnp.float32) + b2_ref[...]
    h = _leaky_relu(h)                                             # (128, TB)
    h = jnp.dot(w3_ref[...], h, preferred_element_type=jnp.float32) + b3_ref[...]
    h = _leaky_relu(h)                                             # (64, TB)

    # ---- layer 4 (out=2): tiny output — lane-broadcast multiply + sublane
    # (XLU) reduction instead of streaming (64, TB) through the MXU ------------
    w4 = w4_ref[...]                                               # (64, 2)
    o0 = jnp.sum(w4[:, 0:1] * h, axis=0, keepdims=True)            # (1, TB)
    o1 = jnp.sum(w4[:, 1:2] * h, axis=0, keepdims=True)            # (1, TB)
    out = jnp.concatenate([o0, o1], axis=0) + b4_ref[...]          # (2, TB)

    o_ref[...] = out.astype(o_ref.dtype)


def _choose_tiling(B, tb):
    """Padding-aware batch tiling.

    Returns (TB, B_pad, n_tiles) with TB a multiple of 128, B_pad = TB*n_tiles,
    and n_tiles >= 2 whenever the batch spans more than one 128-lane tile so
    the 'parallel' grid axis can shard across v7x's two TensorCores.
    """
    lane = 128
    b128 = ((B + lane - 1) // lane) * lane
    min_tiles = 2 if b128 >= 2 * lane else 1
    n_tiles = max(min_tiles, -(-b128 // tb))
    tile = -(-b128 // n_tiles)
    tile = ((tile + lane - 1) // lane) * lane
    return tile, tile * n_tiles, n_tiles


def net_forward(x, params, l1, l2, tb=4096):
    """x: [B, 2] float32.  params: dict of [in, out] weights / (1, out) biases.

    Returns [B, 2] float32, identical to the PyTorch forward (the in-place
    mutation of the caller's input in the original module is not reproduced).
    """
    B = x.shape[0]

    # ---- one-time (traced, outside the kernel) operand preparation ----------
    # Fold the input scaling (1/l1, 1/l2) into the columns of W1^T.
    scale_row = jnp.array([[1.0 / l1, 1.0 / l2]], dtype=jnp.float32)  # (1, 2)
    w1 = params["w1"].T * scale_row            # (64, 2)   — per-input-column scale
    w2 = params["w2"].T                        # (128, 64)
    w3 = params["w3"].T                        # (64, 128)
    w4 = params["w4"]                          # (64, 2)   — kept (in, out) for layer 4
    b1 = params["b1"].T                        # (64, 1)
    b2 = params["b2"].T                        # (128, 1)
    b3 = params["b3"].T                        # (64, 1)
    b4 = params["b4"].T                        # (2, 1)

    TB, B_pad, n_tiles = _choose_tiling(B, tb)

    # TODO(synk): callers that can keep a feature-major (2, B) layout end to end
    # could drop this transpose/pad and the final slice/transpose entirely.
    xT = jnp.pad(x.T, ((0, 0), (0, B_pad - B)))                    # (2, B_pad)

    const = lambda i: (0, 0)   # resident weights/biases: same block every step

    grid_spec = pltpu.PrefetchScalarGridSpec(
        num_scalar_prefetch=0,
        grid=(n_tiles,),
        in_specs=[
            pl.BlockSpec((2, TB), lambda i: (0, i)),     # x tile (batch on lanes)
            pl.BlockSpec(w1.shape, const), pl.BlockSpec(b1.shape, const),
            pl.BlockSpec(w2.shape, const), pl.BlockSpec(b2.shape, const),
            pl.BlockSpec(w3.shape, const), pl.BlockSpec(b3.shape, const),
            pl.BlockSpec(w4.shape, const), pl.BlockSpec(b4.shape, const),
        ],
        out_specs=pl.BlockSpec((2, TB), lambda i: (0, i)),
    )

    # Rough VMEM estimate: double-buffered (2, TB) x/out tiles + live f32
    # activations + the (tiny) resident weights.  Only raise the scoped limit
    # when it would exceed v5e's 16 MiB default; cap under v7x's 64 MiB phys.
    rows_live = 2 + 64 + 128 + 64 + 64 + 2          # x, h1, h2, h3, l4 temps, out
    vmem_est = int(1.5 * (8 * TB * 4 + rows_live * TB * 4
                          + 4 * (2 * 64 + 128 * 64 + 64 * 128 + 64 * 2 + 258)))
    cp_kwargs = {}
    if vmem_est > 12 * 1024 * 1024:
        cp_kwargs["vmem_limit_bytes"] = int(min(max(vmem_est, 24 * 1024 * 1024),
                                                48 * 1024 * 1024))

    outT = pl.pallas_call(
        net_kernel,
        out_shape=jax.ShapeDtypeStruct((2, B_pad), jnp.float32),
        grid_spec=grid_spec,
        compiler_params=pltpu.CompilerParams(
            dimension_semantics=("parallel",),
            **cp_kwargs,
        ),
    )(xT, w1, b1, w2, b2, w3, b3, w4, b4)

    return outT[:, :B].T


def init_params(key):
    """Deterministic init mimicking nn.Linear's uniform(-1/sqrt(fan_in), +)."""
    dims = [(2, 64), (64, 128), (128, 64), (64, 2)]
    params = {}
    keys = jax.random.split(key, 2 * len(dims))
    for i, (fan_in, fan_out) in enumerate(dims):
        bound = 1.0 / jnp.sqrt(fan_in)
        w = jax.random.uniform(keys[2 * i], (fan_in, fan_out),
                               minval=-bound, maxval=bound, dtype=jnp.float32)
        b = jax.random.uniform(keys[2 * i + 1], (1, fan_out),
                               minval=-bound, maxval=bound, dtype=jnp.float32)
        params[f"w{i + 1}"] = w
        params[f"b{i + 1}"] = b
    return params


def reference_forward(x, params, l1, l2):
    """Pure-JAX reference for correctness checking (mirrors the PyTorch math)."""
    scale = jnp.array([[1.0 / l1, 1.0 / l2]], dtype=jnp.float32)
    h = x * scale
    h = _leaky_relu(h @ params["w1"] + params["b1"])
    h = _leaky_relu(h @ params["w2"] + params["b2"])
    h = _leaky_relu(h @ params["w3"] + params["b3"])
    h = h @ params["w4"] + params["b4"]
    return h


if __name__ == "__main__":
    key = jax.random.PRNGKey(0)
    k_param, k_x1, k_x2 = jax.random.split(key, 3)

    l1, l2 = 2.0, 1.5
    params = init_params(k_param)

    # Small batch: single 128-lane tile (padded 8 -> 128).
    B1 = 8
    x1 = jax.random.normal(k_x1, (B1, 2), dtype=jnp.float32)
    out1 = jax.block_until_ready(net_forward(x1, params, l1, l2))
    ref1 = reference_forward(x1, params, l1, l2)
    assert out1.shape == (B1, 2)
    assert jnp.allclose(out1, ref1, atol=1e-5, rtol=1e-5)

    # Medium batch: exercises >=2 grid tiles (v7x two-core sharding path),
    # resident weights across grid steps, and tail padding (300 -> 2 x 256).
    B2 = 300
    x2 = jax.random.normal(k_x2, (B2, 2), dtype=jnp.float32)
    out2 = jax.block_until_ready(net_forward(x2, params, l1, l2, tb=4096))
    ref2 = reference_forward(x2, params, l1, l2)
    assert out2.shape == (B2, 2)
    assert jnp.allclose(out2, ref2, atol=1e-5, rtol=1e-5)

    print("KERNEL_OK")
</pallas_src>

<mosaic_0001>
module attributes {stable_mosaic.version = 11 : i64} {
  func.func @net_kernel(%arg0: i32, %arg1: memref<2x128xf32, #tpu.memory_space<vmem>>, %arg2: memref<64x2xf32, #tpu.memory_space<vmem>>, %arg3: memref<64x1xf32, #tpu.memory_space<vmem>>, %arg4: memref<128x64xf32, #tpu.memory_space<vmem>>, %arg5: memref<128x1xf32, #tpu.memory_space<vmem>>, %arg6: memref<64x128xf32, #tpu.memory_space<vmem>>, %arg7: memref<64x1xf32, #tpu.memory_space<vmem>>, %arg8: memref<64x2xf32, #tpu.memory_space<vmem>>, %arg9: memref<2x1xf32, #tpu.memory_space<vmem>>, %arg10: memref<2x128xf32, #tpu.memory_space<vmem>>) attributes {dimension_semantics = [#tpu.dimension_semantics<parallel>], iteration_bounds = array<i64: 1>, scalar_prefetch = 0 : i64, scratch_operands = 0 : i64, tpu.core_type = #tpu.core_type<tc>, window_params = [{transform_indices = @transform_0, window_bounds = array<i64: 2, 128>}, {pipeline_mode = #tpu.pipeline_mode<synchronous>, transform_indices = @transform_1, window_bounds = array<i64: 64, 2>}, {pipeline_mode = #tpu.pipeline_mode<synchronous>, transform_indices = @transform_2, window_bounds = array<i64: 64, 1>}, {pipeline_mode = #tpu.pipeline_mode<synchronous>, transform_indices = @transform_3, window_bounds = array<i64: 128, 64>}, {pipeline_mode = #tpu.pipeline_mode<synchronous>, transform_indices = @transform_4, window_bounds = array<i64: 128, 1>}, {pipeline_mode = #tpu.pipeline_mode<synchronous>, transform_indices = @transform_5, window_bounds = array<i64: 64, 128>}, {pipeline_mode = #tpu.pipeline_mode<synchronous>, transform_indices = @transform_6, window_bounds = array<i64: 64, 1>}, {pipeline_mode = #tpu.pipeline_mode<synchronous>, transform_indices = @transform_7, window_bounds = array<i64: 64, 2>}, {pipeline_mode = #tpu.pipeline_mode<synchronous>, transform_indices = @transform_8, window_bounds = array<i64: 2, 1>}, {transform_indices = @transform_9, window_bounds = array<i64: 2, 128>}]} {
    %c0 = arith.constant 0 : index
    %c0_0 = arith.constant 0 : index
    %0 = vector.load %arg1[%c0, %c0_0] : memref<2x128xf32, #tpu.memory_space<vmem>>, vector<2x128xf32>
    %c0_1 = arith.constant 0 : index
    %c0_2 = arith.constant 0 : index
    %1 = vector.load %arg2[%c0_1, %c0_2] : memref<64x2xf32, #tpu.memory_space<vmem>>, vector<64x2xf32>
    %2 = vector.extract_strided_slice %1 {offsets = [0, 0], sizes = [64, 1], strides = [1, 1]} : vector<64x2xf32> to vector<64x1xf32>
    %3 = vector.extract_strided_slice %0 {offsets = [0, 0], sizes = [1, 128], strides = [1, 1]} : vector<2x128xf32> to vector<1x128xf32>
    %4 = vector.broadcast %2 : vector<64x1xf32> to vector<64x128xf32>
    %5 = vector.broadcast %3 : vector<1x128xf32> to vector<64x128xf32>
    %6 = arith.mulf %4, %5 : vector<64x128xf32>
    %7 = vector.extract_strided_slice %1 {offsets = [0, 1], sizes = [64, 1], strides = [1, 1]} : vector<64x2xf32> to vector<64x1xf32>
    %8 = vector.extract_strided_slice %0 {offsets = [1, 0], sizes = [1, 128], strides = [1, 1]} : vector<2x128xf32> to vector<1x128xf32>
    %9 = vector.broadcast %7 : vector<64x1xf32> to vector<64x128xf32>
    %10 = vector.broadcast %8 : vector<1x128xf32> to vector<64x128xf32>
    %11 = arith.mulf %9, %10 : vector<64x128xf32>
    %12 = arith.addf %6, %11 : vector<64x128xf32>
    %c0_3 = arith.constant 0 : index
    %c0_4 = arith.constant 0 : index
    %13 = vector.load %arg3[%c0_3, %c0_4] : memref<64x1xf32, #tpu.memory_space<vmem>>, vector<64x1xf32>
    %14 = vector.broadcast %13 : vector<64x1xf32> to vector<64x128xf32>
    %15 = arith.addf %12, %14 : vector<64x128xf32>
    %cst = arith.constant 0.00999999977 : f32
    %16 = vector.broadcast %cst : f32 to vector<64x128xf32>
    %17 = arith.mulf %16, %15 : vector<64x128xf32>
    %18 = arith.maximumf %15, %17 : vector<64x128xf32>
    %c0_5 = arith.constant 0 : index
    %c0_6 = arith.constant 0 : index
    %19 = vector.load %arg4[%c0_5, %c0_6] : memref<128x64xf32, #tpu.memory_space<vmem>>, vector<128x64xf32>
    %cst_7 = arith.constant dense<0.000000e+00> : vector<128x128xf32>
    %20 = tpu.matmul %19, %18, %cst_7 {dimension_numbers = #tpu.dot_dimension_numbers<[1], [0], [0], [1], [0, 0, 1, 1], [], []>} : vector<128x64xf32>, vector<64x128xf32>, vector<128x128xf32> -> vector<128x128xf32>
    %c0_8 = arith.constant 0 : index
    %c0_9 = arith.constant 0 : index
    %21 = vector.load %arg5[%c0_8, %c0_9] : memref<128x1xf32, #tpu.memory_space<vmem>>, vector<128x1xf32>
    %22 = vector.broadcast %21 : vector<128x1xf32> to vector<128x128xf32>
    %23 = arith.addf %20, %22 : vector<128x128xf32>
    %cst_10 = arith.constant 0.00999999977 : f32
    %24 = vector.broadcast %cst_10 : f32 to vector<128x128xf32>
    %25 = arith.mulf %24, %23 : vector<128x128xf32>
    %26 = arith.maximumf %23, %25 : vector<128x128xf32>
    %c0_11 = arith.constant 0 : index
    %c0_12 = arith.constant 0 : index
    %27 = vector.load %arg6[%c0_11, %c0_12] : memref<64x128xf32, #tpu.memory_space<vmem>>, vector<64x128xf32>
    %cst_13 = arith.constant dense<0.000000e+00> : vector<64x128xf32>
    %28 = tpu.matmul %27, %26, %cst_13 {dimension_numbers = #tpu.dot_dimension_numbers<[1], [0], [0], [1], [0, 0, 1, 1], [], []>} : vector<64x128xf32>, vector<128x128xf32>, vector<64x128xf32> -> vector<64x128xf32>
    %c0_14 = arith.constant 0 : index
    %c0_15 = arith.constant 0 : index
    %29 = vector.load %arg7[%c0_14, %c0_15] : memref<64x1xf32, #tpu.memory_space<vmem>>, vector<64x1xf32>
    %30 = vector.broadcast %29 : vector<64x1xf32> to vector<64x128xf32>
    %31 = arith.addf %28, %30 : vector<64x128xf32>
    %cst_16 = arith.constant 0.00999999977 : f32
    %32 = vector.broadcast %cst_16 : f32 to vector<64x128xf32>
    %33 = arith.mulf %32, %31 : vector<64x128xf32>
    %34 = arith.maximumf %31, %33 : vector<64x128xf32>
    %c0_17 = arith.constant 0 : index
    %c0_18 = arith.constant 0 : index
    %35 = vector.load %arg8[%c0_17, %c0_18] : memref<64x2xf32, #tpu.memory_space<vmem>>, vector<64x2xf32>
    %36 = vector.extract_strided_slice %35 {offsets = [0, 0], sizes = [64, 1], strides = [1, 1]} : vector<64x2xf32> to vector<64x1xf32>
    %37 = vector.broadcast %36 : vector<64x1xf32> to vector<64x128xf32>
    %38 = arith.mulf %37, %34 : vector<64x128xf32>
    %cst_19 = arith.constant dense<0.000000e+00> : vector<128xf32>
    %39 = vector.multi_reduction <add>, %38, %cst_19 [0] : vector<64x128xf32> to vector<128xf32>
    %40 = vector.shape_cast %39 : vector<128xf32> to vector<1x128xf32>
    %41 = vector.extract_strided_slice %35 {offsets = [0, 1], sizes = [64, 1], strides = [1, 1]} : vector<64x2xf32> to vector<64x1xf32>
    %42 = vector.broadcast %41 : vector<64x1xf32> to vector<64x128xf32>
    %43 = arith.mulf %42, %34 : vector<64x128xf32>
    %cst_20 = arith.constant dense<0.000000e+00> : vector<128xf32>
    %44 = vector.multi_reduction <add>, %43, %cst_20 [0] : vector<64x128xf32> to vector<128xf32>
    %45 = vector.shape_cast %44 : vector<128xf32> to vector<1x128xf32>
    %46 = tpu.concatenate %40, %45 in 0 : vector<1x128xf32>, vector<1x128xf32> -> vector<2x128xf32>
    %c0_21 = arith.constant 0 : index
    %c0_22 = arith.constant 0 : index
    %47 = vector.load %arg9[%c0_21, %c0_22] : memref<2x1xf32, #tpu.memory_space<vmem>>, vector<2x1xf32>
    %48 = vector.broadcast %47 : vector<2x1xf32> to vector<2x128xf32>
    %49 = arith.addf %46, %48 : vector<2x128xf32>
    %c0_23 = arith.constant 0 : index
    %c0_24 = arith.constant 0 : index
    %50 = vector.load %arg10[%c0_23, %c0_24] : memref<2x128xf32, #tpu.memory_space<vmem>>, vector<2x128xf32>
    tpu.vector_store %arg10[%c0_23, %c0_24], %49 {strides = array<i32>} : memref<2x128xf32, #tpu.memory_space<vmem>>, vector<2x128xf32>,
    return
  }
  func.func @transform_0(%arg0: i32) -> (i32, i32) {
    %c0_i32 = arith.constant 0 : i32
    %c0_i32_0 = arith.constant 0 : i32
    return %c0_i32, %arg0 : i32, i32
  }
  func.func @transform_1(%arg0: i32) -> (i32, i32) {
    %c0_i32 = arith.constant 0 : i32
    %c0_i32_0 = arith.constant 0 : i32
    %c0_i32_1 = arith.constant 0 : i32
    return %c0_i32, %c0_i32_0 : i32, i32
  }
  func.func @transform_2(%arg0: i32) -> (i32, i32) {
    %c0_i32 = arith.constant 0 : i32
    %c0_i32_0 = arith.constant 0 : i32
    %c0_i32_1 = arith.constant 0 : i32
    return %c0_i32, %c0_i32_0 : i32, i32
  }
  func.func @transform_3(%arg0: i32) -> (i32, i32) {
    %c0_i32 = arith.constant 0 : i32
    %c0_i32_0 = arith.constant 0 : i32
    %c0_i32_1 = arith.constant 0 : i32
    return %c0_i32, %c0_i32_0 : i32, i32
  }
  func.func @transform_4(%arg0: i32) -> (i32, i32) {
    %c0_i32 = arith.constant 0 : i32
    %c0_i32_0 = arith.constant 0 : i32
    %c0_i32_1 = arith.constant 0 : i32
    return %c0_i32, %c0_i32_0 : i32, i32
  }
  func.func @transform_5(%arg0: i32) -> (i32, i32) {
    %c0_i32 = arith.constant 0 : i32
    %c0_i32_0 = arith.constant 0 : i32
    %c0_i32_1 = arith.constant 0 : i32
    return %c0_i32, %c0_i32_0 : i32, i32
  }
  func.func @transform_6(%arg0: i32) -> (i32, i32) {
    %c0_i32 = arith.constant 0 : i32
    %c0_i32_0 = arith.constant 0 : i32
    %c0_i32_1 = arith.constant 0 : i32
    return %c0_i32, %c0_i32_0 : i32, i32
  }
  func.func @transform_7(%arg0: i32) -> (i32, i32) {
    %c0_i32 = arith.constant 0 : i32
    %c0_i32_0 = arith.constant 0 : i32
    %c0_i32_1 = arith.constant 0 : i32
    return %c0_i32, %c0_i32_0 : i32, i32
  }
  func.func @transform_8(%arg0: i32) -> (i32, i32) {
    %c0_i32 = arith.constant 0 : i32
    %c0_i32_0 = arith.constant 0 : i32
    %c0_i32_1 = arith.constant 0 : i32
    return %c0_i32, %c0_i32_0 : i32, i32
  }
  func.func @transform_9(%arg0: i32) -> (i32, i32) {
    %c0_i32 = arith.constant 0 : i32
    %c0_i32_0 = arith.constant 0 : i32
    return %c0_i32, %arg0 : i32, i32
  }
}

</mosaic_0001>

<bundles_post_ra>
// kernel: tpu_custom_call.1
= control target key start
LH: loop header
LB: loop body
LE: loop exit
PB: predicated region body
PF: predicated region fallthrough
CT: control target
= control target key end

     0   :  { %v1119_v2 = vmov 1   ;;  %v1120_v7 = vmov 0   ;;  %s1439_s0 = inlined_call_operand.vmem [shape: f32[2,128], index: 0, kind: input, shape index: {}]   ;;  %s1440_s1 = inlined_call_operand.vmem [shape: f32[64,2], index: 1, kind: input, shape index: {}]   ;;  %s1441_s2 = inlined_call_operand.vmem [shape: f32[64,1], index: 2, kind: input, shape index: {}]   ;;  %s1442_s3 = inlined_call_operand.vmem [shape: f32[128,64], index: 3, kind: input, shape index: {}]   ;;  %s1443_s4 = inlined_call_operand.vmem [shape: f32[128,1], index: 4, kind: input, shape index: {}]   ;;  %s1444_s5 = inlined_call_operand.vmem [shape: f32[64,128], index: 5, kind: input, shape index: {}]   ;;  %s1445_s6 = inlined_call_operand.vmem [shape: f32[64,1], index: 6, kind: input, shape index: {}]   ;;  %s1446_s7 = inlined_call_operand.vmem [shape: f32[64,2], index: 7, kind: input, shape index: {}]   ;;  %s1447_s8 = inlined_call_operand.vmem [shape: f32[2,1], index: 8, kind: input, shape index: {}]   ;;  %s1448_s9 = inlined_call_operand.hbm [shape: f32[2,128], index: 9, kind: output, shape index: {}]  }
   0x1   :  { %v36_v0 = vld [vmem:[%s1440_s1 + $0x10] sm:$0xff]  ;;  %v34_v1 = vld [vmem:[%s1440_s1] sm:$0xff]  ;;  %1080 = vset.pattern.permute.xlu0 %v1119_v2  ;;  %1078 = vset.pattern.permute.xlu1 %v1119_v2  ;;  %v35_v4 = vld [vmem:[%s1440_s1 + $0x8] sm:$0xff] }
   0x2   :  { %103 = vperm.xlu0 %1080, %v36_v0   ;;  %95 = vperm.xlu1 %1078, %v34_v1   ;;  %v38_v3 = vld [vmem:[%s1440_s1 + $0x20] sm:$0xff]  ;;  %v40_v5 = vld [vmem:[%s1440_s1 + $0x30] sm:$0xff]  ;;  %v37_v6 = vld [vmem:[%s1440_s1 + $0x18] sm:$0xff] }
   0x6   :  { %111 = vperm.xlu0 %1080, %v38_v3   ;;  %99 = vperm.xlu1 %1078, %v35_v4  }
   0xa   :  { %119 = vperm.xlu0 %1080, %v40_v5   ;;  %1079 = vset.pattern.permute.xlu1 %v1120_v7 }
   0xb   :  { %59 = vperm.xlu1 %1079, %v37_v6  }
   0xc   :  { %14 = vsyncpa [#allocation3], 0  ;;  %v146_v8 = vld [vmem:[%s1441_s2] sm:$0xff]  ;;  %v147_v9 = vld [vmem:[%s1441_s2 + $0x8] sm:$0xff]  ;;  %vm330_vm0 = vcmask 523264   ;;  %v82_v40 = vlaneseq  ;;  %vm855_vm1 = vcmask 1040384  }
   0xd   :  { %v39_v10 = vld [vmem:[%s1440_s1 + $0x28] sm:$0xff]  ;;  %v149_v11 = vld [vmem:[%s1441_s2 + $0x18] sm:$0xff]  ;;  %v234_v13 = vld [vmem:[%s1443_s4] sm:$0xff] }
   0xe   :  { %1085 = vset.pattern.permute.xlu0 %v1120_v7  ;;  %v151_v12 = vld [vmem:[%s1441_s2 + $0x28] sm:$0xff]  ;;  %v148_v14 = vld [vmem:[%s1441_s2 + $0x10] sm:$0xff]  ;;  %v238_v16 = vld [vmem:[%s1443_s4 + $0x20] sm:$0xff]  ;;  %v83_v43 = vshrl.u32 %v82_v40, 7 }
   0xf   :  { %44 = vperm.xlu0 %1085, %v34_v1   ;;  %1081 = vset.pattern.permute.xlu1 %v1119_v2  ;;  %v236_v15 = vld [vmem:[%s1443_s4 + $0x10] sm:$0xff]  ;;  %v41_v17 = vld [vmem:[%s1440_s1 + $0x38] sm:$0xff]  ;;  %v242_v19 = vld [vmem:[%s1443_s4 + $0x40] sm:$0xff] }
  0x10   :  { %107 = vperm.xlu1 %1081, %v37_v6   ;;  %v240_v18 = vld [vmem:[%s1443_s4 + $0x30] sm:$0xff]  ;;  %v150_v20 = vld [vmem:[%s1441_s2 + $0x20] sm:$0xff]  ;;  %v153_v24 = vld [vmem:[%s1441_s2 + $0x38] sm:$0xff]  ;;  %v128_v46 = vsub.s32 1, %v83_v43  ;;  %v84_v47 = vsub.s32 0, %v83_v43 }
  0x11   :  { %v244_v21 = vld [vmem:[%s1443_s4 + $0x50] sm:$0xff]  ;;  %v246_v23 = vld [vmem:[%s1443_s4 + $0x60] sm:$0xff]  ;;  %v235_v26 = vld [vmem:[%s1443_s4 + $0x8] sm:$0xff] }
  0x12   :  { %v152_v22 = vld [vmem:[%s1441_s2 + $0x30] sm:$0xff]  ;;  %v237_v27 = vld [vmem:[%s1443_s4 + $0x18] sm:$0xff]  ;;  %v239_v28 = vld [vmem:[%s1443_s4 + $0x28] sm:$0xff] }
  0x13   :  { %49 = vperm.xlu0 %1085, %v35_v4   ;;  %v248_v25 = vld [vmem:[%s1443_s4 + $0x70] sm:$0xff]  ;;  %v218_v29 = vld [vmem:[%s1442_s3] sm:$0xff]  ;;  %v241_v30 = vld [vmem:[%s1443_s4 + $0x38] sm:$0xff] }
  0x14   :  { %1082 = vset.pattern.permute.xlu1 %v1120_v7  ;;  %959 = vmatprep.mubr.msk.f32.mxu0 %vm330_vm0, %v218_v29  ;;  %v243_v31 = vld [vmem:[%s1443_s4 + $0x48] sm:$0xff]  ;;  %v245_v32 = vld [vmem:[%s1443_s4 + $0x58] sm:$0xff]  ;;  %v733_v37 = vld [vmem:[%s1446_s7] sm:$0xff] }
  0x15   :  { %156 = vperm.xlu1 %1082, %v146_v8   ;;  %v247_v33 = vld [vmem:[%s1443_s4 + $0x68] sm:$0xff]  ;;  %v249_v34 = vld [vmem:[%s1443_s4 + $0x78] sm:$0xff]  ;;  %v33_v48 = vld [vmem:[%s1439_s0] sm:$0x3] }
  0x16   :  { %v565_v35 = vld [vmem:[%s1445_s6 + $0x8] sm:$0xff]  ;;  %v567_v36 = vld [vmem:[%s1445_s6 + $0x18] sm:$0xff]  ;;  %v129_v50 = vrot.slane %v33_v48, %v128_v46  ;;  %v85_v51 = vrot.slane %v33_v48, %v84_v47 }
  0x17   :  { %54 = vperm.xlu0 %1085, %v36_v0  }
  0x19   :  { %64 = vperm.xlu1 %1082, %v38_v3  }
  0x1b   :  { %161 = vperm.xlu0 %1085, %v147_v9  }
  0x1d   :  { %69 = vperm.xlu1 %1082, %v39_v10  }
  0x1f   :  { %171 = vperm.xlu0 %1085, %v149_v11  }
  0x21   :  { %1083 = vset.pattern.permute.xlu1 %v1119_v2 }
  0x22   :  { %115 = vperm.xlu1 %1083, %v39_v10  }
  0x23   :  { %181 = vperm.xlu0 %1085, %v151_v12  }
  0x26   :  { %1084 = vset.pattern.permute.xlu1 %v1120_v7 }
  0x27   :  { %252 = vperm.xlu0 %1085, %v234_v13   ;;  %166 = vperm.xlu1 %1084, %v148_v14  }
  0x2b   :  { %262 = vperm.xlu0 %1085, %v236_v15   ;;  %74 = vperm.xlu1 %1084, %v40_v5  }
  0x2f   :  { %272 = vperm.xlu0 %1085, %v238_v16   ;;  %79 = vperm.xlu1 %1084, %v41_v17  }
  0x33   :  { %282 = vperm.xlu0 %1085, %v240_v18   ;;  %1086 = vset.pattern.permute.xlu1 %v1119_v2 }
  0x34   :  { %123 = vperm.xlu1 %1086, %v41_v17  }
  0x37   :  { %292 = vperm.xlu0 %1085, %v242_v19  }
  0x38   :  { %1087 = vset.pattern.permute.xlu1 %v1120_v7 }
  0x39   :  { %176 = vperm.xlu1 %1087, %v150_v20  }
  0x3b   :  { %302 = vperm.xlu0 %1085, %v244_v21  }
  0x3d   :  { %186 = vperm.xlu1 %1087, %v152_v22  }
  0x3f   :  { %312 = vperm.xlu0 %1085, %v246_v23  }
  0x41   :  { %191 = vperm.xlu1 %1087, %v153_v24  }
  0x43   :  { %322 = vperm.xlu0 %1085, %v248_v25  }
  0x45   :  { %257 = vperm.xlu1 %1087, %v235_v26  }
  0x47   :  { %1089 = vset.pattern.permute.xlu0 %v1119_v2 }
  0x49   :  { %267 = vperm.xlu1 %1087, %v237_v27  }
  0x4d   :  { %277 = vperm.xlu1 %1087, %v239_v28  }
  0x51   :  { %287 = vperm.xlu1 %1087, %v241_v30  }
  0x55   :  { %297 = vperm.xlu1 %1087, %v243_v31  }
  0x59   :  { %307 = vperm.xlu1 %1087, %v245_v32  }
  0x5d   :  { %317 = vperm.xlu1 %1087, %v247_v33  }
  0x61   :  { %327 = vperm.xlu1 %1087, %v249_v34  }
  0x65   :  { %579 = vperm.xlu1 %1087, %v565_v35  }
  0x69   :  { %589 = vperm.xlu1 %1087, %v567_v36  }
  0x6d   :  { %743 = vperm.xlu1 %1087, %v733_v37  }
  0x71   :  { %1088 = vset.pattern.permute.xlu1 %v1119_v2 }
  0x72   :  { %803 = vperm.xlu1 %1088, %v733_v37  }
  0x76   :  { %1090 = vset.pattern.permute.xlu1 %v1120_v7 }
  0x81   :  { %v96_v38 = vpop.permute.xlu1 %95  ;;  %v104_v39 = vpop.permute.xlu0 %103 }
  0x82   :  { %v130_v55 = vmul.f32 %v129_v50, %v96_v38  ;;  %v132_v12 = vmul.f32 %v129_v50, %v104_v39 }
  0x85   :  { %v100_v41 = vpop.permute.xlu1 %99  ;;  %v112_v42 = vpop.permute.xlu0 %111 }
  0x86   :  { %v131_v60 = vmul.f32 %v129_v50, %v100_v41  ;;  %v134_v31 = vmul.f32 %v129_v50, %v112_v42 }
  0x89   :  { %v120_v44 = vpop.permute.xlu0 %119 }
  0x8a   :  { %v60_v45 = vpop.permute.xlu1 %59  ;;  %v136_v39 = vmul.f32 %v129_v50, %v120_v44 }
  0x8b   :  { %v89_v8 = vmul.f32 %v85_v51, %v60_v45 }
  0x8e   :  { %v45_v49 = vpop.permute.xlu0 %44 }
  0x8f   :  { %v108_v52 = vpop.permute.xlu1 %107  ;;  %v86_v53 = vmul.f32 %v85_v51, %v45_v49 }
  0x90   :  { %v133_v5 = vmul.f32 %v129_v50, %v108_v52 }
  0x91   :  { %v138_v58 = vadd.f32 %v130_v55, %v86_v53 }
  0x92   :  { %v50_v54 = vpop.permute.xlu0 %49  ;;  %v141_v14 = vadd.f32 %v133_v5, %v89_v8  ;;  %v228_v5 = vld [vmem:[%s1442_s3 + $0x50] sm:$0xff]  ;;  %v230_v8 = vld [vmem:[%s1442_s3 + $0x60] sm:$0xff] }
  0x93   :  { %v87_v57 = vmul.f32 %v85_v51, %v50_v54 }
  0x94   :  { %v157_v56 = vpop.permute.xlu1 %156 }
  0x95   :  { %v194_v61 = vadd.f32 %v157_v56, %v138_v58  ;;  %v139_v63 = vadd.f32 %v131_v60, %v87_v57 }
  0x96   :  { %v55_v59 = vpop.permute.xlu0 %54 }
  0x97   :  { %v202_v1 = vmul.f32 0.01, %v194_v61  ;;  %v88_v13 = vmul.f32 %v85_v51, %v55_v59 }
  0x98   :  { %v65_v62 = vpop.permute.xlu1 %64 }
  0x99   :  { %v210_v9 = vmax.f32 %v194_v61, %v202_v1  ;;  %v140_v18 = vadd.f32 %v132_v12, %v88_v13  ;;  %v90_v32 = vmul.f32 %v85_v51, %v65_v62  ;;  %v221_v61 = vld [vmem:[%s1442_s3 + $0x18] sm:$0xff]  ;;  %v222_v62 = vld [vmem:[%s1442_s3 + $0x20] sm:$0xff]  ;;  %v734_v13 = vld [vmem:[%s1446_s7 + $0x8] sm:$0xff] }
  0x9a   :  { %v162_v0 = vpop.permute.xlu0 %161  ;;  %v225_v1 = vld [vmem:[%s1442_s3 + $0x38] sm:$0xff]  ;;  %v556_v12 = vld [vmem:[%s1444_s5] sm:$0xff]  ;;  %807 = vperm.xlu0 %1089, %v734_v13  }
  0x9b   :  { %v195_v3 = vadd.f32 %v162_v0, %v139_v63  ;;  %v142_v37 = vadd.f32 %v134_v31, %v90_v32  ;;  %v223_v63 = vld [vmem:[%s1442_s3 + $0x28] sm:$0xff]  ;;  %v224_v0 = vld [vmem:[%s1442_s3 + $0x30] sm:$0xff]  ;;  %1015 = vmatprep.mubr.f32.mxu1 %v556_v12 }
  0x9c   :  { %v70_v4 = vpop.permute.xlu1 %69 }
  0x9d   :  { %v203_v6 = vmul.f32 0.01, %v195_v3  ;;  %v91_v29 = vmul.f32 %v85_v51, %v70_v4  ;;  %v227_v4 = vld [vmem:[%s1442_s3 + $0x48] sm:$0xff] }
  0x9e   :  { %v172_v11 = vpop.permute.xlu0 %171 }
  0x9f   :  { %v211_v10 = vmax.f32 %v195_v3, %v203_v6  ;;  %v197_v17 = vadd.f32 %v172_v11, %v141_v14  ;;  %v226_v3 = vld [vmem:[%s1442_s3 + $0x40] sm:$0xff]  ;;  %v229_v6 = vld [vmem:[%s1442_s3 + $0x58] sm:$0xff]  ;;  %v735_v14 = vld [vmem:[%s1446_s7 + $0x10] sm:$0xff] }
  0xa0   :  { %v233_v11 = vld [vmem:[%s1442_s3 + $0x78] sm:$0xff]  ;;  %811 = vperm.xlu0 %1089, %v735_v14  }
  0xa1   :  { %v116_v15 = vpop.permute.xlu1 %115  ;;  %v1027_v16 = vpack.c.bf16 %v211_v10, %v210_v9  ;;  %v205_v20 = vmul.f32 0.01, %v197_v17  ;;  %v231_v9 = vld [vmem:[%s1442_s3 + $0x68] sm:$0xff]  ;;  %v232_v10 = vld [vmem:[%s1442_s3 + $0x70] sm:$0xff] }
  0xa2   :  { %v135_v26 = vmul.f32 %v129_v50, %v116_v15  ;;  %v182_v34 = vpop.permute.xlu0 %181  ;;  %v569_v15 = vld [vmem:[%s1445_s6 + $0x28] sm:$0xff] }
  0xa3   :  { %1028 = vmatprep.subr.bf16.mxu0 %v1027_v16  ;;  %v213_v24 = vmax.f32 %v197_v17, %v205_v20  ;;  %599 = vperm.xlu1 %1090, %v569_v15   ;;  %v570_v17 = vld [vmem:[%s1445_s6 + $0x30] sm:$0xff]  ;;  %v736_v20 = vld [vmem:[%s1446_s7 + $0x18] sm:$0xff] }
  0xa4   :  { %1030 = vmatpush3.bf16.msra.mxu0 %v1027_v16  ;;  %v143_v30 = vadd.f32 %v135_v26, %v91_v29  ;;  %v564_v16 = vld [vmem:[%s1445_s6] sm:$0xff]  ;;  %1091 = vset.pattern.permute.xlu0 %v1120_v7 }
  0xa5   :  { %574 = vperm.xlu0 %1091, %v564_v16  }
  0xa6   :  { %v167_v19 = vpop.permute.xlu1 %166  ;;  %v199_v35 = vadd.f32 %v182_v34, %v143_v30  ;;  %v253_v26 = vpop.permute.xlu0 %252 }
  0xa7   :  { %v196_v21 = vadd.f32 %v167_v19, %v140_v18  ;;  %753 = vperm.xlu1 %1090, %v735_v14   ;;  %v566_v18 = vld [vmem:[%s1445_s6 + $0x10] sm:$0xff]  ;;  %v568_v19 = vld [vmem:[%s1445_s6 + $0x20] sm:$0xff] }
  0xa8   :  { %v207_v40 = vmul.f32 0.01, %v199_v35 }
  0xa9   :  { %v204_v22 = vmul.f32 0.01, %v196_v21  ;;  %584 = vperm.xlu0 %1091, %v566_v18  }
  0xaa   :  { %v75_v23 = vpop.permute.xlu1 %74  ;;  %v215_v48 = vmax.f32 %v199_v35, %v207_v40 }
  0xab   :  { %v212_v25 = vmax.f32 %v196_v21, %v204_v22  ;;  %v92_v36 = vmul.f32 %v85_v51, %v75_v23  ;;  %604 = vperm.xlu1 %1090, %v570_v17   ;;  %v571_v21 = vld [vmem:[%s1445_s6 + $0x38] sm:$0xff]  ;;  %v737_v22 = vld [vmem:[%s1446_s7 + $0x20] sm:$0xff]  ;;  %v738_v23 = vld [vmem:[%s1446_s7 + $0x28] sm:$0xff] }
  0xad   :  { %v1031_v27 = vpack.c.bf16 %v213_v24, %v212_v25  ;;  %v144_v46 = vadd.f32 %v136_v39, %v92_v36  ;;  %594 = vperm.xlu0 %1091, %v568_v19   ;;  %v740_v24 = vld [vmem:[%s1446_s7 + $0x38] sm:$0xff] }
  0xae   :  { %v80_v28 = vpop.permute.xlu1 %79 }
  0xaf   :  { %1032 = vmatprep.subr.bf16.mxu0 %v1031_v27  ;;  %v93_v49 = vmul.f32 %v85_v51, %v80_v28  ;;  %v220_v51 = vld [vmem:[%s1442_s3 + $0x10] sm:$0xff]  ;;  %1092 = vset.pattern.permute.xlu1 %v1119_v2  ;;  %v263_v28 = vpop.permute.xlu0 %262 }
  0xb0   :  { %1034 = vmatpush3.bf16.msra.mxu0 %v1031_v27  ;;  %815 = vperm.xlu1 %1092, %v736_v20  }
  0xb1   :  { %748 = vperm.xlu0 %1091, %v734_v13  }
  0xb3   :  { %v124_v33 = vpop.permute.xlu1 %123  ;;  %v273_v30 = vpop.permute.xlu0 %272 }
  0xb4   :  { %v137_v43 = vmul.f32 %v129_v50, %v124_v33  ;;  %v219_v50 = vld [vmem:[%s1442_s3 + $0x8] sm:$0xff]  ;;  %1093 = vset.pattern.permute.xlu1 %v1120_v7  ;;  %v739_v7 = vld [vmem:[%s1446_s7 + $0x30] sm:$0xff] }
  0xb5   :  { %609 = vperm.xlu1 %1093, %v571_v21   ;;  %758 = vperm.xlu0 %1091, %v736_v20  }
  0xb6   :  { %v145_v54 = vadd.f32 %v137_v43, %v93_v49 }
  0xb7   :  { %v283_v39 = vpop.permute.xlu0 %282 }
  0xb8   :  { %v177_v38 = vpop.permute.xlu1 %176 }
  0xb9   :  { %v198_v41 = vadd.f32 %v177_v38, %v142_v37  ;;  %1094 = vset.pattern.permute.xlu1 %v1119_v2  ;;  %763 = vperm.xlu0 %1091, %v737_v22   ;;  %v857_v2 = vld [vmem:[%s1447_s8] sm:$0x3] }
  0xba   :  { %819 = vperm.xlu1 %1094, %v737_v22  }
  0xbb   :  { %v206_v45 = vmul.f32 0.01, %v198_v41 }
  0xbc   :  { %v187_v47 = vpop.permute.xlu1 %186 }
  0xbd   :  { %v214_v52 = vmax.f32 %v198_v41, %v206_v45  ;;  %v200_v53 = vadd.f32 %v187_v47, %v144_v46  ;;  %768 = vperm.xlu0 %1091, %v738_v23  }
  0xbe   :  { %823 = vperm.xlu1 %1094, %v738_v23  }
  0xbf   :  { %v1035_v42 = vpack.c.bf16 %v215_v48, %v214_v52  ;;  %v208_v56 = vmul.f32 0.01, %v200_v53 }
  0xc0   :  { %v192_v55 = vpop.permute.xlu1 %191 }
  0xc1   :  { %v201_v57 = vadd.f32 %v192_v55, %v145_v54  ;;  %1036 = vmatprep.subr.bf16.mxu0 %v1035_v42  ;;  %v216_v59 = vmax.f32 %v200_v53, %v208_v56  ;;  %773 = vperm.xlu0 %1091, %v739_v7  }
  0xc2   :  { %1038 = vmatpush3.bf16.msra.mxu0 %v1035_v42  ;;  %827 = vperm.xlu1 %1094, %v739_v7  }
  0xc3   :  { %v209_v58 = vmul.f32 0.01, %v201_v57 }
  0xc4   :  { %v258_v25 = vpop.permute.xlu1 %257 }
  0xc5   :  { %v217_v44 = vmax.f32 %v201_v57, %v209_v58  ;;  %778 = vperm.xlu0 %1091, %v740_v24   ;;  %v293_v58 = vpop.permute.xlu0 %292 }
  0xc6   :  { %831 = vperm.xlu1 %1094, %v740_v24  }
  0xc7   :  { %v1039_v60 = vpack.c.bf16 %v217_v44, %v216_v59 }
  0xc8   :  { %v268_v27 = vpop.permute.xlu1 %267 }
  0xc9   :  { %1040 = vmatprep.subr.bf16.mxu0 %v1039_v60  ;;  %860 = vperm.xlu0 %1091, %v857_v2  }
  0xca   :  { %1042 = vmatpush3.bf16.msra.mxu0 %v1039_v60 }
  0xcc   :  { %v278_v29 = vpop.permute.xlu1 %277 }
  0xcd   :  { %960 = vmatmul.mubr.msk.f32.vlgmr.msra.gmra.mrb[0].mxu0 %vm330_vm0, %v219_v50 }
  0xce   :  { %962 = vmatprep.mubr.msk.f32.mxu0 %vm330_vm0, %v220_v51 }
  0xd0   :  { %v288_v36 = vpop.permute.xlu1 %287 }
  0xd1   :  { %963 = vmatmul.mubr.msk.f32.gmra.mrb[2].mxu0 %vm330_vm0, %v221_v61 }
  0xd2   :  { %965 = vmatprep.mubr.msk.f32.mxu0 %vm330_vm0, %v222_v62 }
  0xd4   :  { %v298_v55 = vpop.permute.xlu1 %297 }
  0xd5   :  { %966 = vmatmul.mubr.msk.f32.gmra.mrb[4].mxu0 %vm330_vm0, %v223_v63 }
  0xd6   :  { %968 = vmatprep.mubr.msk.f32.mxu0 %vm330_vm0, %v224_v0 }
  0xd9   :  { %969 = vmatmul.mubr.msk.f32.gmra.mrb[6].mxu0 %vm330_vm0, %v225_v1 }
  0xda   :  { %971 = vmatprep.mubr.msk.f32.mxu0 %vm330_vm0, %v226_v3  ;;  %v308_v3 = vpop.permute.xlu1 %307 }
  0xdd   :  { %972 = vmatmul.mubr.msk.f32.gmra.mrb[8].mxu0 %vm330_vm0, %v227_v4 }
  0xde   :  { %974 = vmatprep.mubr.msk.f32.mxu0 %vm330_vm0, %v228_v5  ;;  %v318_v21 = vpop.permute.xlu1 %317 }
  0xe1   :  { %975 = vmatmul.mubr.msk.f32.gmra.mrb[10].mxu0 %vm330_vm0, %v229_v6 }
  0xe2   :  { %977 = vmatprep.mubr.msk.f32.mxu0 %vm330_vm0, %v230_v8  ;;  %v303_v8 = vpop.permute.xlu0 %302 }
  0xe5   :  { %978 = vmatmul.mubr.msk.f32.gmra.mrb[12].mxu0 %vm330_vm0, %v231_v9 }
  0xe6   :  { %980 = vmatprep.mubr.msk.f32.mxu0 %vm330_vm0, %v232_v10  ;;  %v313_v7 = vpop.permute.xlu0 %312 }
  0xe9   :  { %981 = vmatmul.mubr.msk.f32.gmra.mrb[14].mxu0 %vm330_vm0, %v233_v11 }
 0x1a0   :  { %v961_v31 = vpop.f32.mrb[0].mxu0 }
 0x1a1   :  { %v451_v32 = vadd.f32 %v961_v31, %v258_v25  ;;  %v445_v33 = vpop.f32.mrb[1].mxu0 }
 0x1a2   :  { %v446_v34 = vadd.f32 %v445_v33, %v253_v26  ;;  %v328_v33 = vpop.permute.xlu1 %327 }
 0x1a3   :  { %v525_v35 = vmul.f32 0.01, %v451_v32 }
 0x1a4   :  { %v524_v37 = vmul.f32 0.01, %v446_v34  ;;  %v964_v38 = vpop.f32.mrb[2].mxu0 }
 0x1a5   :  { %v541_v40 = vmax.f32 %v451_v32, %v525_v35  ;;  %v461_v41 = vadd.f32 %v964_v38, %v268_v27  ;;  %v455_v43 = vpop.f32.mrb[3].mxu0 }
 0x1a6   :  { %v540_v45 = vmax.f32 %v446_v34, %v524_v37  ;;  %v456_v46 = vadd.f32 %v455_v43, %v263_v28  ;;  %v323_v37 = vpop.permute.xlu0 %322 }
 0x1a7   :  { %v527_v47 = vmul.f32 0.01, %v461_v41 }
 0x1a8   :  { %v526_v48 = vmul.f32 0.01, %v456_v46  ;;  %v967_v49 = vpop.f32.mrb[4].mxu0  ;;  %v1043_v52 = vpack.c.bf16 %v541_v40, %v540_v45 }
 0x1a9   :  { %v543_v53 = vmax.f32 %v461_v41, %v527_v47  ;;  %v471_v54 = vadd.f32 %v967_v49, %v278_v29  ;;  %v465_v42 = vpop.f32.mrb[5].mxu0 }
 0x1aa   :  { %v542_v56 = vmax.f32 %v456_v46, %v526_v48  ;;  %v466_v57 = vadd.f32 %v465_v42, %v273_v30  ;;  %1044 = vmatprep.subr.bf16.mxu1 %v1043_v52  ;;  %v559_v42 = vld [vmem:[%s1444_s5 + $0x18] sm:$0xff] }
 0x1ab   :  { %v529_v59 = vmul.f32 0.01, %v471_v54  ;;  %1046 = vmatpush3.bf16.msra.mxu1 %v1043_v52 }
 0x1ac   :  { %v528_v44 = vmul.f32 0.01, %v466_v57  ;;  %v970_v60 = vpop.f32.mrb[6].mxu0  ;;  %v1047_v50 = vpack.c.bf16 %v543_v53, %v542_v56  ;;  %v557_v53 = vld [vmem:[%s1444_s5 + $0x8] sm:$0xff] }
 0x1ad   :  { %v545_v51 = vmax.f32 %v471_v54, %v529_v59  ;;  %v481_v61 = vadd.f32 %v970_v60, %v288_v36  ;;  %v475_v62 = vpop.f32.mrb[7].mxu0  ;;  %v558_v54 = vld [vmem:[%s1444_s5 + $0x10] sm:$0xff]  ;;  %v561_v56 = vld [vmem:[%s1444_s5 + $0x28] sm:$0xff]  ;;  %v580_v59 = vpop.permute.xlu1 %579 }
 0x1ae   :  { %v544_v63 = vmax.f32 %v466_v57, %v528_v44  ;;  %v476_v0 = vadd.f32 %v475_v62, %v283_v39  ;;  %1048 = vmatprep.subr.bf16.mxu1 %v1047_v50  ;;  %v562_v57 = vld [vmem:[%s1444_s5 + $0x30] sm:$0xff]  ;;  %v808_v60 = vpop.permute.xlu0 %807 }
 0x1af   :  { %v531_v1 = vmul.f32 0.01, %v481_v61  ;;  %1050 = vmatpush3.bf16.msra.mxu1 %v1047_v50 }
 0x1b0   :  { %v530_v4 = vmul.f32 0.01, %v476_v0  ;;  %v973_v5 = vpop.f32.mrb[8].mxu0  ;;  %v1051_v6 = vpack.c.bf16 %v545_v51, %v544_v63 }
 0x1b1   :  { %v547_v9 = vmax.f32 %v481_v61, %v531_v1  ;;  %v491_v10 = vadd.f32 %v973_v5, %v298_v55  ;;  %v485_v11 = vpop.f32.mrb[9].mxu0  ;;  %v560_v55 = vld [vmem:[%s1444_s5 + $0x20] sm:$0xff]  ;;  %v590_v44 = vpop.permute.xlu1 %589 }
 0x1b2   :  { %v546_v12 = vmax.f32 %v476_v0, %v530_v4  ;;  %v486_v13 = vadd.f32 %v485_v11, %v293_v58  ;;  %1052 = vmatprep.subr.bf16.mxu1 %v1051_v6  ;;  %v563_v58 = vld [vmem:[%s1444_s5 + $0x38] sm:$0xff]  ;;  %v812_v61 = vpop.permute.xlu0 %811  ;;  %s1121_s5 = smov [#allocation2]  }
 0x1b3   :  { %v533_v14 = vmul.f32 0.01, %v491_v10  ;;  %1054 = vmatpush3.bf16.msra.mxu1 %v1051_v6  ;;  %s871_s11 = sshll.u32 %s1121_s5, 4  ;;  %s872_s11 = int_to_ptr.vmem [resolvable:$true] %s871_s11 }
 0x1b4   :  { %v532_v15 = vmul.f32 0.01, %v486_v13  ;;  %v976_v16 = vpop.f32.mrb[10].mxu0  ;;  %v1055_v17 = vpack.c.bf16 %v547_v9, %v546_v12  ;;  %s1095_s12 = scalar_lea.vmem %s872_s11, 32  ;;  %p1100_p1 = scmp.lt.s32.totalorder %s872_s11, %s872_s11 }
 0x1b5   :  { %v549_v18 = vmax.f32 %v491_v10, %v533_v14  ;;  %v501_v19 = vadd.f32 %v976_v16, %v308_v3  ;;  %v495_v20 = vpop.f32.mrb[11].mxu0  ;;  %v744_v50 = vpop.permute.xlu1 %743  ;;  %p1096_p0 = scmp.ne.s32.totalorder %s872_s11, %s1095_s12  ;;  %p1101_p2 = scmp.lt.s32.totalorder %s1095_s12, %s1095_s12 }
 0x1b6   :  { %v548_v22 = vmax.f32 %v486_v13, %v532_v15  ;;  %v496_v23 = vadd.f32 %v495_v20, %v303_v8  ;;  %1056 = vmatprep.subr.bf16.mxu1 %v1055_v17  ;;  %v575_v63 = vpop.permute.xlu0 %574 }
 0x1b7   :  { %v535_v24 = vmul.f32 0.01, %v501_v19  ;;  %1058 = vmatpush3.bf16.msra.mxu1 %v1055_v17  ;;  %p1102_p3 = por %p1101_p2, %p1100_p1 }
 0x1b8   :  { %v534_v2 = vmul.f32 0.01, %v496_v23  ;;  %v979_v25 = vpop.f32.mrb[12].mxu0  ;;  %v1059_v26 = vpack.c.bf16 %v549_v18, %v548_v22 }
 0x1b9   :  { %v551_v27 = vmax.f32 %v501_v19, %v535_v24  ;;  %v511_v28 = vadd.f32 %v979_v25, %v318_v21  ;;  %v505_v29 = vpop.f32.mrb[13].mxu0  ;;  %v804_v51 = vpop.permute.xlu1 %803  ;;  %p1103_p4 = pnand %p1102_p3, %p1096_p0 }
 0x1ba   :  { %v550_v30 = vmax.f32 %v496_v23, %v534_v2  ;;  %v506_v31 = vadd.f32 %v505_v29, %v313_v7  ;;  %1060 = vmatprep.subr.bf16.mxu1 %v1059_v26  ;;  %v585_v1 = vpop.permute.xlu0 %584 }
 0x1bb   :  { %v537_v32 = vmul.f32 0.01, %v511_v28  ;;  %1062 = vmatpush3.bf16.msra.mxu1 %v1059_v26 }
 0x1bc   :  { %v536_v34 = vmul.f32 0.01, %v506_v31  ;;  %v982_v35 = vpop.f32.mrb[14].mxu0  ;;  %v1063_v36 = vpack.c.bf16 %v551_v27, %v550_v30 }
 0x1bd   :  { %v553_v38 = vmax.f32 %v511_v28, %v537_v32  ;;  %v521_v39 = vadd.f32 %v982_v35, %v328_v33  ;;  %v515_v40 = vpop.f32.mrb[15].mxu0  ;;  %v600_v62 = vpop.permute.xlu1 %599 }
 0x1be   :  { %v552_v41 = vmax.f32 %v506_v31, %v536_v34  ;;  %v516_v43 = vadd.f32 %v515_v40, %v323_v37  ;;  %1064 = vmatprep.subr.bf16.mxu1 %v1063_v36  ;;  %v595_v4 = vpop.permute.xlu0 %594 }
 0x1bf   :  { %v539_v45 = vmul.f32 0.01, %v521_v39  ;;  %1066 = vmatpush3.bf16.msra.mxu1 %v1063_v36 }
 0x1c0   :  { %v538_v46 = vmul.f32 0.01, %v516_v43  ;;  %v1067_v47 = vpack.c.bf16 %v553_v38, %v552_v41 }
 0x1c1   :  { %v555_v48 = vmax.f32 %v521_v39, %v539_v45  ;;  %v754_v0 = vpop.permute.xlu1 %753 }
 0x1c2   :  { %v554_v49 = vmax.f32 %v516_v43, %v538_v46  ;;  %1068 = vmatprep.subr.bf16.mxu1 %v1067_v47  ;;  %v749_v6 = vpop.permute.xlu0 %748 }
 0x1c3   :  { %1070 = vmatpush3.bf16.msra.mxu1 %v1067_v47 }
 0x1c4   :  { %v1071_v52 = vpack.c.bf16 %v555_v48, %v554_v49 }
 0x1c5   :  { %v605_v3 = vpop.permute.xlu1 %604 }
 0x1c6   :  { %1072 = vmatprep.subr.bf16.mxu1 %v1071_v52  ;;  %v759_v9 = vpop.permute.xlu0 %758 }
 0x1c7   :  { %1074 = vmatpush3.bf16.msra.mxu1 %v1071_v52 }
 0x1c9   :  { %v816_v5 = vpop.permute.xlu1 %815 }
 0x1ca   :  { %1016 = vmatmul.mubr.f32.vlgmr.msra.gmra.mrb[0].mxu1 %v557_v53  ;;  %v764_v16 = vpop.permute.xlu0 %763 }
 0x1cb   :  { %1018 = vmatprep.mubr.f32.mxu1 %v558_v54 }
 0x1cd   :  { %v610_v8 = vpop.permute.xlu1 %609 }
 0x1ce   :  { %1019 = vmatmul.mubr.f32.gmra.mrb[2].mxu1 %v559_v42  ;;  %v769_v32 = vpop.permute.xlu0 %768 }
 0x1cf   :  { %1021 = vmatprep.mubr.f32.mxu1 %v560_v55 }
 0x1d1   :  { %v820_v14 = vpop.permute.xlu1 %819 }
 0x1d2   :  { %1022 = vmatmul.mubr.f32.gmra.mrb[4].mxu1 %v561_v56  ;;  %v774_v56 = vpop.permute.xlu0 %773 }
 0x1d3   :  { %1024 = vmatprep.mubr.f32.mxu1 %v562_v57 }
 0x1d5   :  { %v824_v33 = vpop.permute.xlu1 %823 }
 0x1d6   :  { %1025 = vmatmul.mubr.f32.gmra.mrb[6].mxu1 %v563_v58 }
 0x1d9   :  { %v828_v57 = vpop.permute.xlu1 %827 }
 0x29d   :  { %v1017_v10 = vpop.f32.mrb[0].mxu1 }
 0x29e   :  { %v684_v11 = vadd.f32 %v1017_v10, %v580_v59  ;;  %v678_v12 = vpop.f32.mrb[1].mxu1 }
 0x29f   :  { %v679_v13 = vadd.f32 %v678_v12, %v575_v63 }
 0x2a0   :  { %v718_v15 = vmul.f32 0.01, %v684_v11 }
 0x2a1   :  { %v717_v17 = vmul.f32 0.01, %v679_v13  ;;  %v1020_v18 = vpop.f32.mrb[2].mxu1 }
 0x2a2   :  { %v726_v19 = vmax.f32 %v684_v11, %v718_v15  ;;  %v694_v20 = vadd.f32 %v1020_v18, %v590_v44  ;;  %v688_v21 = vpop.f32.mrb[3].mxu1 }
 0x2a3   :  { %v725_v22 = vmax.f32 %v679_v13, %v717_v17  ;;  %v689_v23 = vadd.f32 %v688_v21, %v585_v1 }
 0x2a4   :  { %v782_v7 = vmul.f32 %v749_v6, %v726_v19  ;;  %v835_v24 = vmul.f32 %v808_v60, %v726_v19  ;;  %v720_v2 = vmul.f32 0.01, %v694_v20 }
 0x2a5   :  { %v781_v25 = vmul.f32 %v744_v50, %v725_v22  ;;  %v834_v26 = vmul.f32 %v804_v51, %v725_v22  ;;  %v719_v27 = vmul.f32 0.01, %v689_v23  ;;  %v1023_v28 = vpop.f32.mrb[4].mxu1 }
 0x2a6   :  { %v728_v29 = vmax.f32 %v694_v20, %v720_v2  ;;  %v704_v30 = vadd.f32 %v1023_v28, %v600_v62  ;;  %v698_v31 = vpop.f32.mrb[5].mxu1 }
 0x2a7   :  { %v789_v34 = vadd.f32 %v782_v7, %v781_v25  ;;  %v842_v35 = vadd.f32 %v835_v24, %v834_v26  ;;  %v727_v36 = vmax.f32 %v689_v23, %v719_v27  ;;  %v699_v37 = vadd.f32 %v698_v31, %v595_v4 }
 0x2a8   :  { %v722_v38 = vmul.f32 0.01, %v704_v30  ;;  %v784_v45 = vmul.f32 %v759_v9, %v728_v29  ;;  %v837_v46 = vmul.f32 %v816_v5, %v728_v29  ;;  %v779_v9 = vpop.permute.xlu0 %778 }
 0x2a9   :  { %v783_v39 = vmul.f32 %v754_v0, %v727_v36  ;;  %v836_v40 = vmul.f32 %v812_v61, %v727_v36  ;;  %v721_v41 = vmul.f32 0.01, %v699_v37  ;;  %v1026_v43 = vpop.f32.mrb[6].mxu1 }
 0x2aa   :  { %v730_v47 = vmax.f32 %v704_v30, %v722_v38  ;;  %v714_v48 = vadd.f32 %v1026_v43, %v610_v8  ;;  %v708_v49 = vpop.f32.mrb[7].mxu1 }
 0x2ab   :  { %v790_v52 = vadd.f32 %v789_v34, %v783_v39  ;;  %v843_v53 = vadd.f32 %v842_v35, %v836_v40  ;;  %v729_v54 = vmax.f32 %v699_v37, %v721_v41  ;;  %v709_v42 = vadd.f32 %v708_v49, %v605_v3  ;;  %v832_v3 = vpop.permute.xlu1 %831 }
 0x2ac   :  { %v724_v55 = vmul.f32 0.01, %v714_v48  ;;  %v786_v51 = vmul.f32 %v769_v32, %v730_v47  ;;  %v839_v61 = vmul.f32 %v824_v33, %v730_v47  ;;  %v861_v26 = vpop.permute.xlu0 %860 }
 0x2ad   :  { %v785_v58 = vmul.f32 %v764_v16, %v729_v54  ;;  %v791_v59 = vadd.f32 %v790_v52, %v784_v45  ;;  %v838_v44 = vmul.f32 %v820_v14, %v729_v54  ;;  %v844_v60 = vadd.f32 %v843_v53, %v837_v46 }
 0x2ae   :  { %v723_v50 = vmul.f32 0.01, %v709_v42  ;;  %v732_v0 = vmax.f32 %v714_v48, %v724_v55 }
 0x2af   :  { %v792_v62 = vadd.f32 %v791_v59, %v785_v58  ;;  %v845_v63 = vadd.f32 %v844_v60, %v838_v44 }
 0x2b0   :  { %v731_v1 = vmax.f32 %v709_v42, %v723_v50  ;;  %v788_v10 = vmul.f32 %v779_v9, %v732_v0  ;;  %v841_v11 = vmul.f32 %v832_v3, %v732_v0 }
 0x2b1   :  { %v793_v4 = vadd.f32 %v792_v62, %v786_v51  ;;  %v846_v5 = vadd.f32 %v845_v63, %v839_v61 }
 0x2b2   :  { %v787_v6 = vmul.f32 %v774_v56, %v731_v1  ;;  %v840_v8 = vmul.f32 %v828_v57, %v731_v1 }
 0x2b4   :  { %v794_v12 = vadd.f32 %v793_v4, %v787_v6  ;;  %v847_v13 = vadd.f32 %v846_v5, %v840_v8 }
 0x2b6   :  { %v795_v15 = vadd.f32 %v794_v12, %v788_v10  ;;  %v848_v14 = vadd.f32 %v847_v13, %v841_v11 }
 0x2b8   :  { %v796_v16 = vrot.slane %v795_v15, 4  ;;  %v849_v17 = vrot.slane %v848_v14, 4 }
 0x2ba   :  { %v797_v18 = vadd.f32 %v796_v16, %v795_v15  ;;  %v850_v19 = vadd.f32 %v849_v17, %v848_v14 }
 0x2bc   :  { %v798_v20 = vrot.slane %v797_v18, 2  ;;  %v851_v21 = vrot.slane %v850_v19, 2 }
 0x2be   :  { %v799_v22 = vadd.f32 %v798_v20, %v797_v18  ;;  %v852_v23 = vadd.f32 %v851_v21, %v850_v19 }
 0x2c0   :  { %v800_v7 = vrot.slane %v799_v22, 1  ;;  %v853_v24 = vrot.slane %v852_v23, 1 }
 0x2c2   :  { %v801_v2 = vadd.f32 %v800_v7, %v799_v22  ;;  %v854_v25 = vadd.f32 %v853_v24, %v852_v23 }
 0x2c4   :  { %v856_v27 = vsel %vm855_vm1, %v801_v2, %v854_v25 }
 0x2c5   :  { %v863_v28 = vadd.f32 %v861_v26, %v856_v27 }
 0x2c7   :  { %864 = vst [vmem:[#allocation2] sm:$0x3] %v863_v28 }
 0x2c8   :  { %1106 = shalt.err (!%p1103_p4)
}
 0x2c9   :  { %s1107_s4 = scalar_lea.hbm %s1448_s9, 32 }
 0x2ca   :  { %p1108_p5 = scmp.ne.s32.totalorder %s1448_s9, %s1107_s4  ;;  %p1111_p6 = scmp.lt.u32.totalorder %s1107_s4, %s1448_s9 }
 0x2cc   :  { %p1113_p7 = pnand %p1111_p6, %p1108_p5 }
 0x2ce   :  { %1116 = shalt.err (!%p1113_p7)
}
 0x2cf   :  { %874 = dma.vmem_to_hbm [thread:$0]  %s872_s11, 32, %s1448_s9, [#allocation3]  }
 0x2d0   :  { %1117 = dma.done.wait [#allocation3], 32  }
 0x2d1   :  { %1118 = vsyncadd [#allocation3], 4294967264 }
 0x2d2   :  { %878 = vsyncpa [#allocation3], 1 }

</bundles_post_ra>
